<compile_context>
chip_gen: v7x
topology: tpu7x:2x2x1
jax: 0.10.0
libtpu: 0.0.40
codegen_flags: <defaults>
</compile_context>

<pallas_src>
import jax
import jax.numpy as jnp
import numpy as np
from jax.experimental import pallas as pl
from jax.experimental.pallas import tpu as pltpu

# ----- small synthetic config (shapes implied by the module's forward) -----
D = 128      # d_model
V = 1024     # vocab size (embedding_size)


# ---------------------------- Pallas kernel ----------------------------
def lm_head_kernel(x_ref, w_ref, tok_ref, m_scratch, i_scratch):
    """One grid step: (TM, D) x (D, TV) logits tile + online argmax over vocab tiles."""
    v = pl.program_id(1)

    @pl.when(v == 0)
    def _():
        m_scratch[...] = jnp.full_like(m_scratch, -jnp.inf)
        i_scratch[...] = jnp.zeros_like(i_scratch)

    # bf16 x bf16 -> f32 accumulate on the MXU (matches m_logits.float() downstream).
    logits = jnp.dot(x_ref[...], w_ref[...],
                     preferred_element_type=jnp.float32)          # (TM, TV) f32

    tv = logits.shape[-1]
    tile_max = jnp.max(logits, axis=-1, keepdims=True)            # (TM, 1)

    # first-occurrence argmax inside the tile (ties -> smallest column index)
    cols = jax.lax.broadcasted_iota(jnp.int32, logits.shape, 1)   # (TM, TV)
    is_max = logits == tile_max
    tile_arg = jnp.min(jnp.where(is_max, cols, tv),
                       axis=-1, keepdims=True) + v * tv           # (TM, 1) int32

    # strict '>' keeps the earlier tile's index on exact ties (first-occurrence semantics)
    better = tile_max > m_scratch[...]
    m_scratch[...] = jnp.where(better, tile_max, m_scratch[...])
    i_scratch[...] = jnp.where(better, tile_arg, i_scratch[...])

    @pl.when(v == pl.num_programs(1) - 1)
    def _():
        tok_ref[...] = i_scratch[...]


# ---------------------------- wrapper ----------------------------
def lm_head_forward(w_ff_out, hidden_states, *, tv=256, tm=None):
    """hidden_states: (B, T, D) f32;  w_ff_out: (D, V) (== torch ff_out.weight.T)."""
    B, T, d = hidden_states.shape
    assert d == w_ff_out.shape[0]
    vocab = w_ff_out.shape[1]
    M = B * T
    if tm is None:
        tm = M
    assert M % tm == 0 and vocab % tv == 0 and tv % 128 == 0

    x = hidden_states.reshape(M, d).astype(jnp.bfloat16)   # fold batch into matmul M
    w = w_ff_out.astype(jnp.bfloat16)                       # bf16 weight stream

    tok = pl.pallas_call(
        lm_head_kernel,
        grid=(M // tm, vocab // tv),
        in_specs=[
            pl.BlockSpec((tm, d), lambda i, v: (i, 0)),      # activations: resident over vocab axis
            pl.BlockSpec((d, tv), lambda i, v: (0, v)),      # weights: streamed, lane-dense vocab tiles
        ],
        out_specs=pl.BlockSpec((tm, 1), lambda i, v: (i, 0)),
        out_shape=jax.ShapeDtypeStruct((M, 1), jnp.int32),
        scratch_shapes=[
            pltpu.VMEM((tm, 1), jnp.float32),   # running max
            pltpu.VMEM((tm, 1), jnp.int32),     # running argmax
        ],
        compiler_params=pltpu.CompilerParams(
            dimension_semantics=("parallel", "arbitrary")),
    )(x, w)

    return tok.reshape(B, T, 1)


# ---------------------------- reference ----------------------------
def lm_head_reference(w_ff_out, hidden_states):
    B, T, d = hidden_states.shape
    x = hidden_states.reshape(B * T, d).astype(jnp.bfloat16)
    logits = jnp.dot(x, w_ff_out.astype(jnp.bfloat16),
                     preferred_element_type=jnp.float32)
    tok = jnp.argmax(logits, axis=-1).astype(jnp.int32)
    return tok.reshape(B, T, 1)


if __name__ == "__main__":
    key = jax.random.PRNGKey(0)
    k0, k1 = jax.random.split(key, 2)

    B, T = 2, 8
    hidden_states = jax.random.normal(k0, (B, T, D), jnp.float32)
    # stored transposed (in, out) so logits = x @ W ; == torch ff_out.weight.T
    w_ff_out = 0.05 * jax.random.normal(k1, (D, V), jnp.float32)

    token = lm_head_forward(w_ff_out, hidden_states)
    jax.block_until_ready(token)

    token_ref = lm_head_reference(w_ff_out, hidden_states)
    assert token.shape == (B, T, 1)
    assert np.array_equal(np.asarray(token), np.asarray(token_ref)), (
        np.asarray(token).ravel(), np.asarray(token_ref).ravel())

    print("KERNEL_OK")
</pallas_src>

<mosaic_0001>
module attributes {stable_mosaic.version = 11 : i64} {
  func.func @lm_head_kernel(%arg0: i32, %arg1: i32, %arg2: memref<16x128xbf16, #tpu.memory_space<vmem>>, %arg3: memref<128x256xbf16, #tpu.memory_space<vmem>>, %arg4: memref<16x1xi32, #tpu.memory_space<vmem>>, %arg5: memref<16x1xf32, #tpu.memory_space<vmem>>, %arg6: memref<16x1xi32, #tpu.memory_space<vmem>>) attributes {dimension_semantics = [#tpu.dimension_semantics<parallel>, #tpu.dimension_semantics<arbitrary>], iteration_bounds = array<i64: 1, 4>, scalar_prefetch = 0 : i64, scratch_operands = 2 : i64, tpu.core_type = #tpu.core_type<tc>, window_params = [{transform_indices = @transform_0, window_bounds = array<i64: 16, 128>}, {transform_indices = @transform_1, window_bounds = array<i64: 128, 256>}, {transform_indices = @transform_2, window_bounds = array<i64: 16, 1>}]} {
    %c0_i32 = arith.constant 0 : i32
    %0 = arith.cmpi eq, %arg1, %c0_i32 : i32
    %1 = arith.extui %0 : i1 to i32
    %c0_i32_0 = arith.constant 0 : i32
    %2 = arith.cmpi ne, %1, %c0_i32_0 : i32
    scf.if %2 {
      %cst_18 = arith.constant 0xFF800000 : f32
      %29 = vector.broadcast %cst_18 : f32 to vector<16x1xf32>
      %c0_19 = arith.constant 0 : index
      %c0_20 = arith.constant 0 : index
      %30 = vector.load %arg5[%c0_19, %c0_20] : memref<16x1xf32, #tpu.memory_space<vmem>>, vector<16x1xf32>
      tpu.vector_store %arg5[%c0_19, %c0_20], %29 {strides = array<i32>} : memref<16x1xf32, #tpu.memory_space<vmem>>, vector<16x1xf32>,
      %c0_i32_21 = arith.constant 0 : i32
      %31 = vector.broadcast %c0_i32_21 : i32 to vector<16x1xi32>
      %c0_22 = arith.constant 0 : index
      %c0_23 = arith.constant 0 : index
      %32 = vector.load %arg6[%c0_22, %c0_23] : memref<16x1xi32, #tpu.memory_space<vmem>>, vector<16x1xi32>
      tpu.vector_store %arg6[%c0_22, %c0_23], %31 {strides = array<i32>} : memref<16x1xi32, #tpu.memory_space<vmem>>, vector<16x1xi32>,
    } else {
    }
    %c0 = arith.constant 0 : index
    %c0_1 = arith.constant 0 : index
    %3 = vector.load %arg2[%c0, %c0_1] : memref<16x128xbf16, #tpu.memory_space<vmem>>, vector<16x128xbf16>
    %c0_2 = arith.constant 0 : index
    %c0_3 = arith.constant 0 : index
    %4 = vector.load %arg3[%c0_2, %c0_3] : memref<128x256xbf16, #tpu.memory_space<vmem>>, vector<128x256xbf16>
    %cst = arith.constant dense<0.000000e+00> : vector<16x256xf32>
    %5 = tpu.matmul %3, %4, %cst {dimension_numbers = #tpu.dot_dimension_numbers<[1], [0], [0], [1], [0, 0, 1, 1], [], []>} : vector<16x128xbf16>, vector<128x256xbf16>, vector<16x256xf32> -> vector<16x256xf32>
    %cst_4 = arith.constant dense<0xFF800000> : vector<16xf32>
    %6 = vector.multi_reduction <maximumf>, %5, %cst_4 [1] : vector<16x256xf32> to vector<16xf32>
    %7 = vector.shape_cast %6 : vector<16xf32> to vector<16x1xf32>
    %8 = tpu.iota {dimensions = array<i32: 1>} : vector<16x256xi32>
    %9 = vector.broadcast %7 : vector<16x1xf32> to vector<16x256xf32>
    %10 = arith.cmpf oeq, %5, %9 : vector<16x256xf32>
    %c256_i32 = arith.constant 256 : i32
    %11 = vector.broadcast %c256_i32 : i32 to vector<16x256xi32>
    %12 = arith.select %10, %8, %11 : vector<16x256xi1>, vector<16x256xi32>
    %cst_5 = arith.constant dense<2147483647> : vector<16xi32>
    %13 = vector.multi_reduction <minsi>, %12, %cst_5 [1] : vector<16x256xi32> to vector<16xi32>
    %14 = vector.shape_cast %13 : vector<16xi32> to vector<16x1xi32>
    %c256_i32_6 = arith.constant 256 : i32
    %15 = arith.muli %arg1, %c256_i32_6 : i32
    %16 = vector.broadcast %15 : i32 to vector<16x1xi32>
    %17 = arith.addi %14, %16 : vector<16x1xi32>
    %c0_7 = arith.constant 0 : index
    %c0_8 = arith.constant 0 : index
    %18 = vector.load %arg5[%c0_7, %c0_8] : memref<16x1xf32, #tpu.memory_space<vmem>>, vector<16x1xf32>
    %19 = arith.cmpf ogt, %7, %18 : vector<16x1xf32>
    %c0_9 = arith.constant 0 : index
    %c0_10 = arith.constant 0 : index
    %20 = vector.load %arg5[%c0_9, %c0_10] : memref<16x1xf32, #tpu.memory_space<vmem>>, vector<16x1xf32>
    %21 = arith.select %19, %7, %20 : vector<16x1xi1>, vector<16x1xf32>
    %c0_11 = arith.constant 0 : index
    %c0_12 = arith.constant 0 : index
    %22 = vector.load %arg5[%c0_11, %c0_12] : memref<16x1xf32, #tpu.memory_space<vmem>>, vector<16x1xf32>
    tpu.vector_store %arg5[%c0_11, %c0_12], %21 {strides = array<i32>} : memref<16x1xf32, #tpu.memory_space<vmem>>, vector<16x1xf32>,
    %c0_13 = arith.constant 0 : index
    %c0_14 = arith.constant 0 : index
    %23 = vector.load %arg6[%c0_13, %c0_14] : memref<16x1xi32, #tpu.memory_space<vmem>>, vector<16x1xi32>
    %24 = arith.select %19, %17, %23 : vector<16x1xi1>, vector<16x1xi32>
    %c0_15 = arith.constant 0 : index
    %c0_16 = arith.constant 0 : index
    %25 = vector.load %arg6[%c0_15, %c0_16] : memref<16x1xi32, #tpu.memory_space<vmem>>, vector<16x1xi32>
    tpu.vector_store %arg6[%c0_15, %c0_16], %24 {strides = array<i32>} : memref<16x1xi32, #tpu.memory_space<vmem>>, vector<16x1xi32>,
    %c3_i32 = arith.constant 3 : i32
    %26 = arith.cmpi eq, %arg1, %c3_i32 : i32
    %27 = arith.extui %26 : i1 to i32
    %c0_i32_17 = arith.constant 0 : i32
    %28 = arith.cmpi ne, %27, %c0_i32_17 : i32
    scf.if %28 {
      %c0_18 = arith.constant 0 : index
      %c0_19 = arith.constant 0 : index
      %29 = vector.load %arg6[%c0_18, %c0_19] : memref<16x1xi32, #tpu.memory_space<vmem>>, vector<16x1xi32>
      %c0_20 = arith.constant 0 : index
      %c0_21 = arith.constant 0 : index
      %30 = vector.load %arg4[%c0_20, %c0_21] : memref<16x1xi32, #tpu.memory_space<vmem>>, vector<16x1xi32>
      tpu.vector_store %arg4[%c0_20, %c0_21], %29 {strides = array<i32>} : memref<16x1xi32, #tpu.memory_space<vmem>>, vector<16x1xi32>,
    } else {
    }
    return
  }
  func.func @transform_0(%arg0: i32, %arg1: i32) -> (i32, i32) {
    %c0_i32 = arith.constant 0 : i32
    %c0_i32_0 = arith.constant 0 : i32
    return %arg0, %c0_i32 : i32, i32
  }
  func.func @transform_1(%arg0: i32, %arg1: i32) -> (i32, i32) {
    %c0_i32 = arith.constant 0 : i32
    %c0_i32_0 = arith.constant 0 : i32
    return %c0_i32, %arg1 : i32, i32
  }
  func.func @transform_2(%arg0: i32, %arg1: i32) -> (i32, i32) {
    %c0_i32 = arith.constant 0 : i32
    %c0_i32_0 = arith.constant 0 : i32
    return %arg0, %c0_i32 : i32, i32
  }
}

</mosaic_0001>

<bundles_post_ra>
// kernel: tpu_custom_call.1
= control target key start
LH: loop header
LB: loop body
LE: loop exit
PB: predicated region body
PF: predicated region fallthrough
CT: control target
= control target key end

     0   :  { %7 = vsyncpa [#allocation5], 0  ;;  %s987_s0 = inlined_call_operand.hbm [shape: bf16[16,128], index: 0, kind: input, shape index: {}]   ;;  %s988_s1 = inlined_call_operand.hbm [shape: bf16[128,1024], index: 1, kind: input, shape index: {}]   ;;  %s989_s2 = inlined_call_operand.vmem [shape: s32[16,1], index: 2, kind: output, shape index: {}]  }
   0x1   :  { %8 = vsyncpa [#allocation7], 0 }
   0x2   :  { %10 = vsyncpa [#allocation7 + $0x1], 0  ;;  %s795_s9 = smov 0   ;;  %s797_s10 = smov 0  }
   0x3   :  { %s799_s11 = smov 0   ;;  %s801_s12 = smov 0  }
   0x4   :  { %s803_s13 = smov 0   ;;  %s805_s14 = smov 0  }
   0x5 LB: > { %s522_s15 = sadd.s32 4294967295, %s768_s14   ;;  %p68_p0 = scmp.ne.s32.totalorder %s756_s11, %s752_s10  ;;  %s768_s14 = sphi %s805_s14, %s16_s14   ;;  %s764_s13 = sphi %s803_s13, %s1008_s13   ;;  %s760_s12 = sphi %s801_s12, %s1007_s12   ;;  %s756_s11 = sphi %s799_s11, %s1006_s11   ;;  %s752_s10 = sphi %s797_s10, %s1005_s10   ;;  %s748_s9 = sphi %s795_s9, %s1004_s9  }
   0x6   : > { %p69_p1 = scmp.eq.s32.totalorder %s768_s14, 0  ;;  %p74_p2 = scmp.ne.s32.totalorder %s752_s10, %s748_s9 }
   0x7   : > { %p828_p3 = scmp.eq.s32.totalorder %s522_s15, 0  ;;  %p523_p4 = scmp.ge.s32.totalorder %s768_s14, 1 }
   0x8   : > { %p70_p5 = por %p69_p1, %p68_p0  ;;  %p111_p6 = scmp.lt.s32.totalorder %s768_s14, 5 }
   0x9   : > { %s995_s16 = scalar_select %p828_p3, 1, 0 }
   0xa   : > { %p836_p7 = por %p828_p3, %p74_p2  ;;  %p840_p8 = pnand %p523_p4, %p111_p6 }
   0xb   : > { %s770_s19 = smov [#allocation4]   ;;  %p572_p11 = scmp.lt.s32.totalorder %s768_s14, 4 }
   0xc   : > { %s996_s17 = scalar_select %p836_p7, 1, 0 }
   0xd   : > { %s997_s18 = scalar_select %p840_p8, 1, 0 }
   0xe   : > { %s126_s20 = sshll.u32 %s770_s19, 4  ;;  %p563_p9 = pneg %p840_p8  ;;  %s127_s20 = int_to_ptr.vmem [resolvable:$true] %s126_s20 }
   0xf   : > { %s61_s22 = sadd.s32 1, %s756_s11  ;;  %p854_p12 = pnand %p572_p11, %p70_p5 }
  0x10   : > { %p848_p10 = pnand %p563_p9, %p828_p3  ;;  %s656_s26 = scalar_lea.hbm %s987_s0, 128 }
  0x11   : > { %s999_s23 = scalar_select %p854_p12, 1, 0 }
  0x12   : > { %p657_p13 = scmp.ne.s32.totalorder %s987_s0, %s656_s26  ;;  %p658_p0 = pneg %p848_p10 }
  0x13   : > { %p663_p4 = scmp.lt.u32.totalorder %s656_s26, %s987_s0 }
  0x14   : > { %p659_p1 = pnand %p658_p0, %p657_p13 }
  0x16   : > { %p660_p2 = pneg %p659_p1 }
  0x18   : > { %p665_p5 = pnand %p663_p4, %p660_p2 }
  0x1a   : > { %668 = shalt.err (!%p665_p5)
}
  0x1b   : > { %s669_s3 = scalar_lea.vmem %s127_s20, 128  ;;  %p677_p7 = scmp.lt.s32.totalorder %s127_s20, %s127_s20 }
  0x1c   : > { %p670_p6 = scmp.ne.s32.totalorder %s127_s20, %s669_s3  ;;  %p678_p3 = scmp.lt.s32.totalorder %s669_s3, %s669_s3 }
  0x1e   : > { %p672_p9 = pnand %p670_p6, %p658_p0  ;;  %p679_p8 = por %p678_p3, %p677_p7 }
  0x20   : > { %p673_p11 = pneg %p672_p9 }
  0x22   : > { %p680_p12 = pnand %p679_p8, %p673_p11 }
  0x24   : > { %683 = shalt.err (!%p680_p12)
}
  0x25   : > { %s771_s4 = smov 64   ;;  %s772_s5 = smov 4  }
  0x26   : > { %566 = dma.hbm_to_vmem [thread:$0]  (!%p848_p10), %s987_s0, 128, %s127_s20, [#allocation5], %s771_s4, %s771_s4, %s772_s5  }
  0x27   : > { %s25_s8 = sadd.s32 1, %s764_s13  ;;  %s140_s9 = sand.u32 1, %s756_s11  }
  0x28   : > { %p26_p3 = scmp.ge.s32.totalorder %s25_s8, 4  ;;  %s526_s15 = sshll.u32 %s140_s9, 7 }
  0x29   : > { %s556_s19 = sshll.u32 %s764_s13, 7  ;;  %s144_s20 = scalar_lea.vmem [#allocation6], %s526_s15 }
  0x2a   : > { %s1010_s8 = smov (%p26_p3, %s25_s8), 0  ;;  %s882_s26 = scalar_lea.hbm %s988_s1, %s556_s19 }
  0x2b   : > { %s58_s21 = ssub.s32 %s764_s13, %s1010_s8  ;;  %s151_s27 = sshll.u32 %s144_s20, 4  ;;  %s886_s27 = int_to_ptr.vmem [resolvable:$true] %s151_s27 }
  0x2c   : > { %p59_p7 = scmp.eq.s32.totalorder %s58_s21, 0  ;;  %s893_s29 = scalar_lea.sflag [#allocation7], %s140_s9 }
  0x2d   : > { %s684_s30 = scalar_lea.hbm %s882_s26, 2048  ;;  %p1000_p10 = scmp.ne.s32.totalorder %s999_s23, 0 }
  0x2e   : > { %s891_s28 = scalar_select %p59_p7, %s756_s11, %s61_s22  }
  0x2f   : > { %p685_p8 = scmp.ne.s32.totalorder %s882_s26, %s684_s30  ;;  %p686_p12 = pneg %p1000_p10 }
  0x30   : > { %s689_s5 = scalar_lea.hbm %s988_s1, 8192  ;;  %p690_p1 = scmp.lt.u32.totalorder %s882_s26, %s988_s1 }
  0x31   : > { %p687_p13 = pnand %p686_p12, %p685_p8  ;;  %p691_p2 = scmp.lt.u32.totalorder %s689_s5, %s684_s30 }
  0x32   : > { %p693_p5 = scmp.lt.u32.totalorder %s684_s30, %s882_s26 }
  0x33   : > { %p688_p0 = pneg %p687_p13  ;;  %p692_p4 = por %p691_p2, %p690_p1 }
  0x35   : > { %p694_p6 = por %p693_p5, %p692_p4 }
  0x37   : > { %p695_p9 = pnand %p694_p6, %p688_p0 }
  0x39   : > { %698 = shalt.err (!%p695_p9)
}
  0x3a   : > { %s699_s22 = scalar_lea.vmem %s886_s27, 2048  ;;  %s773_s9 = smov [#allocation6]  }
  0x3b   : > { %p700_p11 = scmp.ne.s32.totalorder %s886_s27, %s699_s22  ;;  %s704_s15 = sshll.u32 %s773_s9, 4  ;;  %s705_s15 = int_to_ptr.vmem [resolvable:$false] %s704_s15 }
  0x3c   : > { %s706_s19 = scalar_lea.vmem %s705_s15, 4096  ;;  %p707_p8 = scmp.lt.s32.totalorder %s886_s27, %s705_s15 }
  0x3d   : > { %p702_p3 = pnand %p700_p11, %p686_p12  ;;  %p708_p13 = scmp.lt.s32.totalorder %s706_s19, %s699_s22 }
  0x3f   : > { %p703_p7 = pneg %p702_p3  ;;  %p709_p1 = por %p708_p13, %p707_p8 }
  0x41   : > { %p710_p2 = pnand %p709_p1, %p703_p7 }
  0x43   : > { %713 = shalt.err (!%p710_p2)
}
  0x44   : > { %s774_s24 = smov 512   ;;  %s775_s25 = smov 128  }
  0x45   : > { %s776_s21 = smov 8   ;;  %p1001_p12 = scmp.ne.s32.totalorder %s997_s18, 0 }
  0x46   : > { %570 = dma.hbm_to_vmem [thread:$0]  (!%p1000_p10), %s882_s26, 2048, %s886_s27, %s893_s29, %s774_s24, %s775_s25, %s776_s21  }
  0x47   : > { %163 = sbr.rel (%p1001_p12) target bundleno = 796 (0x31c), region = 28  ;;  %p1002_p0 = scmp.ne.s32.totalorder (!%p1001_p12), %s995_s16, 0 }
  0x4e   : > { %739 = dma.done.wait (%p1002_p0), [#allocation5], 128  }
  0x4f   : > { %741 = vsyncadd (%p1002_p0), [#allocation5], 4294967168  ;;  %s169_s20 = sand.u32 1, %s752_s10   ;;  %p1003_p4 = scmp.ne.s32.totalorder %s996_s17, 0 }
  0x50   : > { %s531_s30 = sshll.u32 %s169_s20, 7  ;;  %s170_s3 = scalar_lea.sflag [#allocation7], %s169_s20 }
  0x51   : > { %s928_s4 = scalar_lea.vmem [#allocation6], %s531_s30 }
  0x52   : > { %743 = dma.done.wait (%p1003_p4), %s170_s3, 2048  }
  0x53   : > { %745 = vsyncadd (%p1003_p4), %s170_s3, 4294965248  ;;  %p532_p10 = scmp.ne.s32.totalorder %s760_s12, 0 }
  0x54   : > { %vm207_vm0 = vcmask (!%p532_p10), 7168   ;;  %v777_v0 = vmov (!%p532_p10), -inf   ;;  %v778_v1 = vmov (!%p532_p10), 0  }
  0x55   : > { %206 = sbr.rel (%p532_p10) target bundleno = 92 (0x5c), region = 40  ;;  %208 = vst.msk [vmem:[#allocation2] sm:$0xff] (!%p532_p10), %vm207_vm0, %v777_v0  ;;  %209 = vst.msk [vmem:[#allocation2 + $0x8] sm:$0xff] (!%p532_p10), %vm207_vm0, %v777_v0 }
  0x56   : > { %210 = vst.msk [vmem:[#allocation3] sm:$0xff] (!%p532_p10), %vm207_vm0, %v778_v1  ;;  %211 = vst.msk [vmem:[#allocation3 + $0x8] sm:$0xff] (!%p532_p10), %vm207_vm0, %v778_v1 }
  0x5c PF: > { %v631_v2 = vld [vmem:[%s928_s4 + $0x4] ss:$8 sps:$4 sm:$0xff]   ;;  %v633_v3 = vld [vmem:[%s928_s4] ss:$8 sps:$4 sm:$0xff]   ;;  %v779_v4 = vmov 0   ;;  %v655_v19 = vld [vmem:[#allocation4] sm:$0xff]   ;;  %v365_v26 = vlaneseq }
  0x5d   : > { %348 = vmatprep.mubr.bf16.mxu0 %v779_v4  ;;  %316 = vmatprep.subr.bf16.mxu0 %v631_v2  ;;  %v634_v5 = vld [vmem:[%s928_s4 + $0x14] ss:$8 sps:$4 sm:$0xff]   ;;  %v636_v6 = vld [vmem:[%s928_s4 + $0x10] ss:$8 sps:$4 sm:$0xff]   ;;  %v637_v7 = vld [vmem:[%s928_s4 + $0x24] ss:$8 sps:$4 sm:$0xff]  }
  0x5e   : > { %317 = vmatpush1.bf16.msra.mxu0 %v633_v3  ;;  %v639_v8 = vld [vmem:[%s928_s4 + $0x20] ss:$8 sps:$4 sm:$0xff]   ;;  %v640_v9 = vld [vmem:[%s928_s4 + $0x34] ss:$8 sps:$4 sm:$0xff]   ;;  %v642_v10 = vld [vmem:[%s928_s4 + $0x30] ss:$8 sps:$4 sm:$0xff]  }
  0x5f   : > { %318 = vmatprep.subr.bf16.mxu0 %v634_v5  ;;  %v643_v11 = vld [vmem:[%s928_s4 + $0x44] ss:$8 sps:$4 sm:$0xff]   ;;  %v645_v12 = vld [vmem:[%s928_s4 + $0x40] ss:$8 sps:$4 sm:$0xff]   ;;  %v646_v13 = vld [vmem:[%s928_s4 + $0x54] ss:$8 sps:$4 sm:$0xff]  }
  0x60   : > { %v648_v14 = vld [vmem:[%s928_s4 + $0x50] ss:$8 sps:$4 sm:$0xff]   ;;  %v649_v15 = vld [vmem:[%s928_s4 + $0x64] ss:$8 sps:$4 sm:$0xff]   ;;  %v651_v16 = vld [vmem:[%s928_s4 + $0x60] ss:$8 sps:$4 sm:$0xff]  }
  0x61   : > { %v652_v17 = vld [vmem:[%s928_s4 + $0x74] ss:$8 sps:$4 sm:$0xff]   ;;  %v654_v18 = vld [vmem:[%s928_s4 + $0x70] ss:$8 sps:$4 sm:$0xff]   ;;  %v366_v27 = vand.u32 127, %v365_v26  ;;  %vm418_vm1 = vcmask 7168  }
  0x62   : > { %319 = vmatpush1.bf16.msra.mxu0 %v636_v6  ;;  %v412_v28 = vld [vmem:[#allocation2] sm:$0xff]  ;;  %v413_v32 = vld [vmem:[#allocation2 + $0x8] sm:$0xff]  ;;  %s550_s16 = sshll.u32 %s760_s12, 8  ;;  %v421_v60 = vld [vmem:[#allocation3] sm:$0xff]  ;;  %p551_p5 = scmp.ne.s32.totalorder %s760_s12, 3 }
  0x63   : > { %320 = vmatprep.subr.bf16.mxu0 %v637_v7  ;;  %v367_v29 = vadd.s32 128, %v366_v27  ;;  %v409_v58 = vstv %s550_s16  ;;  %v422_v3 = vld [vmem:[#allocation3 + $0x8] sm:$0xff] }
  0x66   : > { %321 = vmatpush1.bf16.msra.mxu0 %v639_v8 }
  0x67   : > { %322 = vmatprep.subr.bf16.mxu0 %v640_v9 }
  0x6a   : > { %323 = vmatpush1.bf16.msra.mxu0 %v642_v10 }
  0x6b   : > { %324 = vmatprep.subr.bf16.mxu0 %v643_v11 }
  0x6e   : > { %325 = vmatpush1.bf16.msra.mxu0 %v645_v12 }
  0x6f   : > { %326 = vmatprep.subr.bf16.mxu0 %v646_v13 }
  0x72   : > { %327 = vmatpush1.bf16.msra.mxu0 %v648_v14 }
  0x73   : > { %328 = vmatprep.subr.bf16.mxu0 %v649_v15 }
  0x76   : > { %329 = vmatpush1.bf16.msra.mxu0 %v651_v16 }
  0x77   : > { %330 = vmatprep.subr.bf16.mxu0 %v652_v17 }
  0x7a   : > { %331 = vmatpush1.bf16.msra.mxu0 %v654_v18 }
  0x7d   : > { %349 = vmatmul.mubr.bf16.vlgmr.msra.gmra.mrb[0].mxu0 %v655_v19 }
 0x150   : > { %v350_v20 = vpop.f32.mrb[0].mxu0 }
 0x151   : > { %v352_v21 = vpop.f32.mrb[1].mxu0 }
 0x152   : > { %v354_v22 = vpop.f32.mrb[2].mxu0  ;;  %v359_v23 = vmax.f32 %v350_v20, %v352_v21 }
 0x153   : > { %v356_v24 = vpop.f32.mrb[3].mxu0 }
 0x154   : > { %v362_v25 = vmax.f32 %v354_v22, %v356_v24  ;;  %360 = vmax.xlane.f32.xlu0 %v359_v23 }
 0x158   : > { %363 = vmax.xlane.f32.xlu0 %v362_v25 }
 0x1e1   : > { %v361_v30 = vpop.xlane.xlu0 %360 }
 0x1e2   : > { %vm368_vm2 = vcmp.eq.f32.partialorder %v350_v20, %v361_v30  ;;  %vm369_vm3 = vcmp.eq.f32.partialorder %v352_v21, %v361_v30  ;;  %vm414_vm4 = vcmp.gt.f32.partialorder %v361_v30, %v412_v28 }
 0x1e3   : > { %v416_v31 = vsel %vm414_vm4, %v361_v30, %v412_v28  ;;  %v372_v33 = vsel %vm368_vm2, %v366_v27, 256  ;;  %v373_v34 = vsel %vm369_vm3, %v367_v29, 256 }
 0x1e4   : > { %419 = vst.msk [vmem:[#allocation2] sm:$0xff] %vm418_vm1, %v416_v31  ;;  %vm376_vm5 = vcmp.lt.s32.totalorder %v372_v33, %v373_v34 }
 0x1e5   : > { %v364_v35 = vpop.xlane.xlu0 %363  ;;  %v377_v36 = vsel %vm376_vm5, %v372_v33, %v373_v34 }
 0x1e6   : > { %vm370_vm6 = vcmp.eq.f32.partialorder %v354_v22, %v364_v35  ;;  %vm371_vm7 = vcmp.eq.f32.partialorder %v356_v24, %v364_v35  ;;  %vm415_vm8 = vcmp.gt.f32.partialorder %v364_v35, %v413_v32  ;;  %v379_v37 = vshra.s32 %v377_v36, 16 }
 0x1e7   : > { %v417_v38 = vsel %vm415_vm8, %v364_v35, %v413_v32  ;;  %v374_v39 = vsel %vm370_vm6, %v366_v27, 256  ;;  %v375_v40 = vsel %vm371_vm7, %v367_v29, 256  ;;  %v378_v45 = vand.u32 65535, %v377_v36 }
 0x1e8   : > { %420 = vst.msk [vmem:[#allocation2 + $0x8] sm:$0xff] %vm418_vm1, %v417_v38  ;;  %v381_v41 = vcvt.s32.f32 %v379_v37  ;;  %vm392_vm9 = vcmp.lt.s32.totalorder %v374_v39, %v375_v40 }
 0x1e9   : > { %v393_v42 = vsel %vm392_vm9, %v374_v39, %v375_v40  ;;  %v380_v47 = vcvt.s32.f32 %v378_v45 }
 0x1ea   : > { %382 = vmin.xlane.f32.xlu1 %v381_v41  ;;  %v395_v43 = vshra.s32 %v393_v42, 16  ;;  %v394_v48 = vand.u32 65535, %v393_v42 }
 0x1ec   : > { %v397_v44 = vcvt.s32.f32 %v395_v43  ;;  %v396_v51 = vcvt.s32.f32 %v394_v48 }
 0x1ee   : > { %398 = vmin.xlane.f32.xlu1 %v397_v44 }
 0x277   : > { %v383_v46 = vpop.xlane.xlu1 %382 }
 0x278   : > { %vm384_vm10 = vcmp.eq.f32.partialorder %v381_v41, %v383_v46  ;;  %v389_v53 = vcvt.f32.s32 %v383_v46 }
 0x279   : > { %v385_v49 = vsel %vm384_vm10, %v380_v47, inf }
 0x27a   : > { %386 = vmin.xlane.f32.xlu0 %v385_v49  ;;  %v390_v55 = vshll.u32 %v389_v53, 16 }
 0x27b   : > { %v399_v50 = vpop.xlane.xlu1 %398 }
 0x27c   : > { %vm400_vm11 = vcmp.eq.f32.partialorder %v397_v44, %v399_v50  ;;  %v405_v56 = vcvt.f32.s32 %v399_v50 }
 0x27d   : > { %v401_v52 = vsel %vm400_vm11, %v396_v51, inf }
 0x27e   : > { %402 = vmin.xlane.f32.xlu1 %v401_v52  ;;  %v406_v62 = vshll.u32 %v405_v56, 16 }
 0x307   : > { %v387_v54 = vpop.xlane.xlu0 %386 }
 0x308   : > { %v388_v57 = vcvt.f32.s32 %v387_v54 }
 0x30a   : > { %v391_v59 = vadd.s32 %v390_v55, %v388_v57 }
 0x30b   : > { %v403_v61 = vpop.xlane.xlu1 %402 }
 0x30c   : > { %v410_v63 = vadd.s32 %v409_v58, %v391_v59  ;;  %v404_v0 = vcvt.f32.s32 %v403_v61 }
 0x30d   : > { %430 = sbr.rel (%p551_p5) target bundleno = 796 (0x31c), region = 44 }
 0x30e   : > { %v423_v1 = vsel %vm414_vm4, %v410_v63, %v421_v60  ;;  %v407_v2 = vadd.s32 %v406_v62, %v404_v0 }
 0x30f   : > { %425 = vst.msk [vmem:[#allocation3] sm:$0xff] %vm418_vm1, %v423_v1 }
 0x310   : > { %v411_v4 = vadd.s32 %v409_v58, %v407_v2 }
 0x312   : > { %v424_v5 = vsel %vm415_vm8, %v411_v4, %v422_v3 }
 0x313   : > { %426 = vst.msk [vmem:[#allocation3 + $0x8] sm:$0xff] %vm418_vm1, %v424_v5 }
 0x316   : > { %v431_v6 = vld [vmem:[#allocation3] sm:$0xff] }
 0x317   : > { %433 = vst.msk [vmem:[%s989_s2] sm:$0xff] %vm418_vm1, %v431_v6 }
 0x31a   : > { %v432_v7 = vld [vmem:[#allocation3 + $0x8] sm:$0xff] }
 0x31b   : > { %434 = vst.msk [vmem:[%s989_s2 + $0x8] sm:$0xff] %vm418_vm1, %v432_v7 }
 0x31c PF: > { %s16_s14 = sadd.s32 1, %s768_s14   ;;  %s1004_s9 = smov %s752_s10 }
 0x31d   : > { %p13_p6 = scmp.ge.s32.totalorder %s16_s14, 6   ;;  %s1005_s10 = smov %s756_s11 }
 0x31e   : > { %s1006_s11 = smov %s891_s28  ;;  %s1007_s12 = smov %s764_s13 }
 0x31f   : > { %s1008_s13 = smov %s1010_s8  ;;  %15 = sbr.rel (!%p13_p6) target bundleno = 5 (0x5), region = 82 }
 0x326   :  { %457 = vsyncpa [#allocation5], 1 }
 0x327   :  { %459 = vsyncpa [#allocation5 + $0x1], 1 }
 0x328   :  { %460 = vsyncpa [#allocation7], 1 }
 0x329   :  { %462 = vsyncpa [#allocation7 + $0x1], 1 }

</bundles_post_ra>
